<compile_context>
chip_gen: v7x
topology: tpu7x:2x2x1
jax: 0.10.0
libtpu: 0.0.40
codegen_flags: <defaults>
</compile_context>

<pallas_src>
import jax
import jax.numpy as jnp
from jax import lax
from jax.experimental import pallas as pl
from jax.experimental.pallas import tpu as pltpu

SUBJECT_CATEGORY_ID = 0  # args.subject_category_id


def _postprocess_kernel(size_ref,                       # SMEM: [B, 2] (h, w)
                        hoi_ref, obj_ref, sub_ref, objb_ref,
                        hoi_s_ref, obj_s_ref, lab_ref, box_ref):
    b = pl.program_id(0)

    # ---------------- score heads: sigmoid (f32 compute, native-dtype store) --
    hoi_s_ref[...] = jax.nn.sigmoid(
        hoi_ref[...].astype(jnp.float32)).astype(hoi_s_ref.dtype)

    obj_f32 = obj_ref[...].astype(jnp.float32)            # (1, Q, C)
    obj_s_ref[...] = jax.nn.sigmoid(obj_f32).astype(obj_s_ref.dtype)

    # ---------------- object labels ------------------------------------------
    # obj_labels = argmax(softmax(logits)[..., :-1]) == argmax(logits[..., :-1])
    # (softmax is monotonic). Mask the last ("no-object") class to -inf, then
    # take the first index attaining the max (matches torch/jnp argmax).
    _, _, C = obj_f32.shape
    cls_iota = lax.broadcasted_iota(jnp.int32, obj_f32.shape, 2)
    masked = jnp.where(cls_iota == C - 1, -jnp.inf, obj_f32)
    mx = jnp.max(masked, axis=-1, keepdims=True)
    idx = jnp.min(jnp.where(masked == mx, cls_iota, C), axis=-1)   # (1, Q) int32
    lab_ref[...] = idx[:, None, :].astype(jnp.int32)               # (1, 1, Q)

    # ---------------- boxes: cxcywh -> xyxy, scale by (w, h, w, h) ------------
    img_h = size_ref[b, 0].astype(jnp.float32)
    img_w = size_ref[b, 1].astype(jnp.float32)

    def cxcywh_to_xyxy(bt):                                # bt: (1, Q, 4)
        bf = bt.astype(jnp.float32)
        cxcy = bf[..., 0:2]
        wh = bf[..., 2:4]
        return jnp.concatenate([cxcy - 0.5 * wh, cxcy + 0.5 * wh], axis=-1)

    xyxy = jnp.concatenate(
        [cxcywh_to_xyxy(sub_ref[...]), cxcywh_to_xyxy(objb_ref[...])],
        axis=1)                                            # (1, 2Q, 4)

    # per-image scale (w, h, w, h) broadcast over the full output slab:
    # even lanes (x coords) * img_w, odd lanes (y coords) * img_h.
    lane = lax.broadcasted_iota(jnp.int32, xyxy.shape, 2)
    scale = jnp.where((lane & 1) == 0, img_w, img_h)

    # single full-tile store: [sub boxes | obj boxes] along the query axis
    box_ref[...] = xyxy * scale


def post_process_hoi_triplet(pred_hoi_logits, pred_obj_logits,
                             pred_sub_boxes, pred_obj_boxes, target_sizes):
    """Pallas implementation of PostProcessHOITriplet.forward.

    Returns a list (per image) of dicts with keys
    labels / boxes / hoi_scores / obj_scores / sub_ids / obj_ids.
    """
    assert pred_hoi_logits.shape[0] == target_sizes.shape[0]
    assert target_sizes.shape[1] == 2

    B, Q, Ch = pred_hoi_logits.shape
    Co = pred_obj_logits.shape[-1]

    out_shapes = (
        jax.ShapeDtypeStruct((B, Q, Ch), pred_hoi_logits.dtype),   # hoi_scores
        jax.ShapeDtypeStruct((B, Q, Co), pred_obj_logits.dtype),   # obj_scores
        jax.ShapeDtypeStruct((B, 1, Q), jnp.int32),                # obj labels
        jax.ShapeDtypeStruct((B, 2 * Q, 4), jnp.float32),          # boxes
    )

    grid_spec = pltpu.PrefetchScalarGridSpec(
        num_scalar_prefetch=1,                 # target_sizes -> SMEM
        grid=(B,),
        in_specs=[
            pl.BlockSpec((1, Q, Ch), lambda b, szs: (b, 0, 0)),
            pl.BlockSpec((1, Q, Co), lambda b, szs: (b, 0, 0)),
            pl.BlockSpec((1, Q, 4), lambda b, szs: (b, 0, 0)),
            pl.BlockSpec((1, Q, 4), lambda b, szs: (b, 0, 0)),
        ],
        out_specs=[
            pl.BlockSpec((1, Q, Ch), lambda b, szs: (b, 0, 0)),
            pl.BlockSpec((1, Q, Co), lambda b, szs: (b, 0, 0)),
            pl.BlockSpec((1, 1, Q), lambda b, szs: (b, 0, 0)),
            pl.BlockSpec((1, 2 * Q, 4), lambda b, szs: (b, 0, 0)),
        ],
    )

    hoi_scores, obj_scores, obj_labels3, boxes = pl.pallas_call(
        _postprocess_kernel,
        out_shape=out_shapes,
        grid_spec=grid_spec,
        compiler_params=pltpu.CompilerParams(
            dimension_semantics=("parallel",),        # megacore-shard over batch
            vmem_limit_bytes=32 * 1024 * 1024),       # fits v5e/v6e/v7x scoped VMEM
    )(target_sizes, pred_hoi_logits, pred_obj_logits,
      pred_sub_boxes, pred_obj_boxes)

    # Cheap XLA glue: constant subject-label half + concat, id ranges, and the
    # per-image result dicts (the torch module moves results to CPU here).
    # TODO(synk): the .to('cpu') host transfer of the torch module is left to
    # the caller (device->host copies are outside the kernel's scope).
    obj_labels = obj_labels3.reshape(B, Q)
    labels = jnp.concatenate(
        [jnp.full((B, Q), SUBJECT_CATEGORY_ID, dtype=jnp.int32), obj_labels],
        axis=1)
    ids = jnp.arange(2 * Q, dtype=jnp.int32)

    results = []
    for i in range(B):
        results.append({
            'labels': labels[i],
            'boxes': boxes[i],
            'hoi_scores': hoi_scores[i],
            'obj_scores': obj_scores[i],
            'sub_ids': ids[:Q],
            'obj_ids': ids[Q:],
        })
    return results


def _reference(hoi, obj, sub_b, obj_b, sizes):
    """Pure-JAX reference of the torch forward (batched arrays)."""
    hoi_scores = jax.nn.sigmoid(hoi)
    obj_scores = jax.nn.sigmoid(obj)
    obj_labels = jnp.argmax(jax.nn.softmax(obj, -1)[..., :-1], axis=-1).astype(jnp.int32)
    img_h = sizes[:, 0].astype(jnp.float32)
    img_w = sizes[:, 1].astype(jnp.float32)
    scale = jnp.stack([img_w, img_h, img_w, img_h], axis=1)[:, None, :]

    def cxcywh_to_xyxy(b):
        cx, cy, w, h = b[..., 0], b[..., 1], b[..., 2], b[..., 3]
        return jnp.stack([cx - 0.5 * w, cy - 0.5 * h, cx + 0.5 * w, cy + 0.5 * h], axis=-1)

    sub_boxes = cxcywh_to_xyxy(sub_b) * scale
    obj_boxes = cxcywh_to_xyxy(obj_b) * scale
    labels = jnp.concatenate(
        [jnp.full_like(obj_labels, SUBJECT_CATEGORY_ID), obj_labels], axis=1)
    boxes = jnp.concatenate([sub_boxes, obj_boxes], axis=1)
    return hoi_scores, obj_scores, labels, boxes


if __name__ == "__main__":
    key = jax.random.PRNGKey(0)
    k1, k2, k3, k4, k5 = jax.random.split(key, 5)

    B, Q = 2, 8
    NUM_HOI_CLASSES = 32
    NUM_OBJ_CLASSES = 16   # last class = "no object"

    pred_hoi_logits = jax.random.normal(k1, (B, Q, NUM_HOI_CLASSES), jnp.float32)
    pred_obj_logits = jax.random.normal(k2, (B, Q, NUM_OBJ_CLASSES), jnp.float32)
    pred_sub_boxes = jax.random.uniform(k3, (B, Q, 4), jnp.float32)   # cxcywh in [0,1]
    pred_obj_boxes = jax.random.uniform(k4, (B, Q, 4), jnp.float32)
    target_sizes = jax.random.randint(k5, (B, 2), 200, 800).astype(jnp.int32)  # (h, w)

    results = post_process_hoi_triplet(pred_hoi_logits, pred_obj_logits,
                                       pred_sub_boxes, pred_obj_boxes, target_sizes)
    jax.block_until_ready(results)

    # Check against pure-JAX reference.
    ref_hoi, ref_obj, ref_labels, ref_boxes = _reference(
        pred_hoi_logits, pred_obj_logits, pred_sub_boxes, pred_obj_boxes,
        target_sizes.astype(jnp.float32))
    for i in range(B):
        assert jnp.allclose(results[i]['hoi_scores'], ref_hoi[i], atol=1e-5)
        assert jnp.allclose(results[i]['obj_scores'], ref_obj[i], atol=1e-5)
        assert jnp.array_equal(results[i]['labels'], ref_labels[i])
        assert jnp.allclose(results[i]['boxes'], ref_boxes[i], atol=1e-4)
        assert jnp.array_equal(results[i]['sub_ids'], jnp.arange(Q))
        assert jnp.array_equal(results[i]['obj_ids'], jnp.arange(Q, 2 * Q))

    print("KERNEL_OK")
</pallas_src>

<mosaic_0001>
module attributes {stable_mosaic.version = 11 : i64} {
  func.func @_postprocess_kernel(%arg0: i32, %arg1: memref<2x2xi32, #tpu.memory_space<smem>>, %arg2: memref<1x8x32xf32, #tpu.memory_space<vmem>>, %arg3: memref<1x8x16xf32, #tpu.memory_space<vmem>>, %arg4: memref<1x8x4xf32, #tpu.memory_space<vmem>>, %arg5: memref<1x8x4xf32, #tpu.memory_space<vmem>>, %arg6: memref<1x8x32xf32, #tpu.memory_space<vmem>>, %arg7: memref<1x8x16xf32, #tpu.memory_space<vmem>>, %arg8: memref<1x1x8xi32, #tpu.memory_space<vmem>>, %arg9: memref<1x16x4xf32, #tpu.memory_space<vmem>>) attributes {dimension_semantics = [#tpu.dimension_semantics<parallel>], iteration_bounds = array<i64: 2>, scalar_prefetch = 1 : i64, scratch_operands = 0 : i64, tpu.core_type = #tpu.core_type<tc>, window_params = [{transform_indices = @transform_0, window_bounds = array<i64: 1, 8, 32>}, {transform_indices = @transform_1, window_bounds = array<i64: 1, 8, 16>}, {transform_indices = @transform_2, window_bounds = array<i64: 1, 8, 4>}, {transform_indices = @transform_3, window_bounds = array<i64: 1, 8, 4>}, {transform_indices = @transform_4, window_bounds = array<i64: 1, 8, 32>}, {transform_indices = @transform_5, window_bounds = array<i64: 1, 8, 16>}, {transform_indices = @transform_6, window_bounds = array<i64: 1, 1, 8>}, {transform_indices = @transform_7, window_bounds = array<i64: 1, 16, 4>}]} {
    %c0 = arith.constant 0 : index
    %c0_0 = arith.constant 0 : index
    %c0_1 = arith.constant 0 : index
    %0 = vector.load %arg2[%c0, %c0_0, %c0_1] : memref<1x8x32xf32, #tpu.memory_space<vmem>>, vector<1x8x32xf32>
    %1 = arith.negf %0 : vector<1x8x32xf32>
    %2 = math.exp %1 : vector<1x8x32xf32>
    %cst = arith.constant 1.000000e+00 : f32
    %3 = vector.broadcast %cst : f32 to vector<1x8x32xf32>
    %4 = arith.addf %3, %2 : vector<1x8x32xf32>
    %5 = arith.divf %3, %4 : vector<1x8x32xf32>
    %c0_2 = arith.constant 0 : index
    %c0_3 = arith.constant 0 : index
    %c0_4 = arith.constant 0 : index
    %6 = vector.load %arg6[%c0_2, %c0_3, %c0_4] : memref<1x8x32xf32, #tpu.memory_space<vmem>>, vector<1x8x32xf32>
    tpu.vector_store %arg6[%c0_2, %c0_3, %c0_4], %5 {strides = array<i32>} : memref<1x8x32xf32, #tpu.memory_space<vmem>>, vector<1x8x32xf32>,
    %c0_5 = arith.constant 0 : index
    %c0_6 = arith.constant 0 : index
    %c0_7 = arith.constant 0 : index
    %7 = vector.load %arg3[%c0_5, %c0_6, %c0_7] : memref<1x8x16xf32, #tpu.memory_space<vmem>>, vector<1x8x16xf32>
    %8 = arith.negf %7 : vector<1x8x16xf32>
    %9 = math.exp %8 : vector<1x8x16xf32>
    %cst_8 = arith.constant 1.000000e+00 : f32
    %10 = vector.broadcast %cst_8 : f32 to vector<1x8x16xf32>
    %11 = arith.addf %10, %9 : vector<1x8x16xf32>
    %12 = arith.divf %10, %11 : vector<1x8x16xf32>
    %c0_9 = arith.constant 0 : index
    %c0_10 = arith.constant 0 : index
    %c0_11 = arith.constant 0 : index
    %13 = vector.load %arg7[%c0_9, %c0_10, %c0_11] : memref<1x8x16xf32, #tpu.memory_space<vmem>>, vector<1x8x16xf32>
    tpu.vector_store %arg7[%c0_9, %c0_10, %c0_11], %12 {strides = array<i32>} : memref<1x8x16xf32, #tpu.memory_space<vmem>>, vector<1x8x16xf32>,
    %14 = tpu.iota {dimensions = array<i32: 2>} : vector<1x8x16xi32>
    %c15_i32 = arith.constant 15 : i32
    %15 = vector.broadcast %c15_i32 : i32 to vector<1x8x16xi32>
    %16 = arith.cmpi eq, %14, %15 : vector<1x8x16xi32>
    %cst_12 = arith.constant 0xFF800000 : f32
    %17 = vector.broadcast %cst_12 : f32 to vector<1x8x16xf32>
    %18 = arith.select %16, %17, %7 : vector<1x8x16xi1>, vector<1x8x16xf32>
    %cst_13 = arith.constant dense<0xFF800000> : vector<1x8xf32>
    %19 = vector.multi_reduction <maximumf>, %18, %cst_13 [2] : vector<1x8x16xf32> to vector<1x8xf32>
    %20 = vector.shape_cast %19 : vector<1x8xf32> to vector<1x8x1xf32>
    %21 = vector.broadcast %20 : vector<1x8x1xf32> to vector<1x8x16xf32>
    %22 = arith.cmpf oeq, %18, %21 : vector<1x8x16xf32>
    %c16_i32 = arith.constant 16 : i32
    %23 = vector.broadcast %c16_i32 : i32 to vector<1x8x16xi32>
    %24 = arith.select %22, %14, %23 : vector<1x8x16xi1>, vector<1x8x16xi32>
    %cst_14 = arith.constant dense<2147483647> : vector<1x8xi32>
    %25 = vector.multi_reduction <minsi>, %24, %cst_14 [2] : vector<1x8x16xi32> to vector<1x8xi32>
    %26 = vector.shape_cast %25 : vector<1x8xi32> to vector<1x1x8xi32>
    %c0_15 = arith.constant 0 : index
    %c0_16 = arith.constant 0 : index
    %c0_17 = arith.constant 0 : index
    %27 = vector.load %arg8[%c0_15, %c0_16, %c0_17] : memref<1x1x8xi32, #tpu.memory_space<vmem>>, vector<1x1x8xi32>
    tpu.vector_store %arg8[%c0_15, %c0_16, %c0_17], %26 {strides = array<i32>} : memref<1x1x8xi32, #tpu.memory_space<vmem>>, vector<1x1x8xi32>,
    %28 = arith.index_cast %arg0 : i32 to index
    %c0_18 = arith.constant 0 : index
    %29 = memref.load %arg1[%28, %c0_18] : memref<2x2xi32, #tpu.memory_space<smem>>
    %30 = arith.sitofp %29 : i32 to f32
    %31 = arith.index_cast %arg0 : i32 to index
    %c1 = arith.constant 1 : index
    %32 = memref.load %arg1[%31, %c1] : memref<2x2xi32, #tpu.memory_space<smem>>
    %33 = arith.sitofp %32 : i32 to f32
    %c0_19 = arith.constant 0 : index
    %c0_20 = arith.constant 0 : index
    %c0_21 = arith.constant 0 : index
    %34 = vector.load %arg4[%c0_19, %c0_20, %c0_21] : memref<1x8x4xf32, #tpu.memory_space<vmem>>, vector<1x8x4xf32>
    %35 = vector.extract_strided_slice %34 {offsets = [0, 0, 0], sizes = [1, 8, 2], strides = [1, 1, 1]} : vector<1x8x4xf32> to vector<1x8x2xf32>
    %36 = vector.extract_strided_slice %34 {offsets = [0, 0, 2], sizes = [1, 8, 2], strides = [1, 1, 1]} : vector<1x8x4xf32> to vector<1x8x2xf32>
    %cst_22 = arith.constant 5.000000e-01 : f32
    %37 = vector.broadcast %cst_22 : f32 to vector<1x8x2xf32>
    %38 = arith.mulf %37, %36 : vector<1x8x2xf32>
    %39 = arith.subf %35, %38 : vector<1x8x2xf32>
    %cst_23 = arith.constant 5.000000e-01 : f32
    %40 = vector.broadcast %cst_23 : f32 to vector<1x8x2xf32>
    %41 = arith.mulf %40, %36 : vector<1x8x2xf32>
    %42 = arith.addf %35, %41 : vector<1x8x2xf32>
    %43 = tpu.concatenate %39, %42 in 2 : vector<1x8x2xf32>, vector<1x8x2xf32> -> vector<1x8x4xf32>
    %c0_24 = arith.constant 0 : index
    %c0_25 = arith.constant 0 : index
    %c0_26 = arith.constant 0 : index
    %44 = vector.load %arg5[%c0_24, %c0_25, %c0_26] : memref<1x8x4xf32, #tpu.memory_space<vmem>>, vector<1x8x4xf32>
    %45 = vector.extract_strided_slice %44 {offsets = [0, 0, 0], sizes = [1, 8, 2], strides = [1, 1, 1]} : vector<1x8x4xf32> to vector<1x8x2xf32>
    %46 = vector.extract_strided_slice %44 {offsets = [0, 0, 2], sizes = [1, 8, 2], strides = [1, 1, 1]} : vector<1x8x4xf32> to vector<1x8x2xf32>
    %cst_27 = arith.constant 5.000000e-01 : f32
    %47 = vector.broadcast %cst_27 : f32 to vector<1x8x2xf32>
    %48 = arith.mulf %47, %46 : vector<1x8x2xf32>
    %49 = arith.subf %45, %48 : vector<1x8x2xf32>
    %cst_28 = arith.constant 5.000000e-01 : f32
    %50 = vector.broadcast %cst_28 : f32 to vector<1x8x2xf32>
    %51 = arith.mulf %50, %46 : vector<1x8x2xf32>
    %52 = arith.addf %45, %51 : vector<1x8x2xf32>
    %53 = tpu.concatenate %49, %52 in 2 : vector<1x8x2xf32>, vector<1x8x2xf32> -> vector<1x8x4xf32>
    %54 = tpu.concatenate %43, %53 in 1 : vector<1x8x4xf32>, vector<1x8x4xf32> -> vector<1x16x4xf32>
    %55 = tpu.iota {dimensions = array<i32: 2>} : vector<1x16x4xi32>
    %c1_i32 = arith.constant 1 : i32
    %56 = vector.broadcast %c1_i32 : i32 to vector<1x16x4xi32>
    %57 = arith.andi %55, %56 : vector<1x16x4xi32>
    %c0_i32 = arith.constant 0 : i32
    %58 = vector.broadcast %c0_i32 : i32 to vector<1x16x4xi32>
    %59 = arith.cmpi eq, %57, %58 : vector<1x16x4xi32>
    %60 = vector.broadcast %33 : f32 to vector<1x16x4xf32>
    %61 = vector.broadcast %30 : f32 to vector<1x16x4xf32>
    %62 = arith.select %59, %60, %61 : vector<1x16x4xi1>, vector<1x16x4xf32>
    %63 = arith.mulf %54, %62 : vector<1x16x4xf32>
    %c0_29 = arith.constant 0 : index
    %c0_30 = arith.constant 0 : index
    %c0_31 = arith.constant 0 : index
    %64 = vector.load %arg9[%c0_29, %c0_30, %c0_31] : memref<1x16x4xf32, #tpu.memory_space<vmem>>, vector<1x16x4xf32>
    tpu.vector_store %arg9[%c0_29, %c0_30, %c0_31], %63 {strides = array<i32>} : memref<1x16x4xf32, #tpu.memory_space<vmem>>, vector<1x16x4xf32>,
    return
  }
  func.func @transform_0(%arg0: i32, %arg1: memref<2x2xi32, #tpu.memory_space<smem>>) -> (i32, i32, i32) {
    %c0_i32 = arith.constant 0 : i32
    %c0_i32_0 = arith.constant 0 : i32
    %c0_i32_1 = arith.constant 0 : i32
    return %arg0, %c0_i32, %c0_i32_0 : i32, i32, i32
  }
  func.func @transform_1(%arg0: i32, %arg1: memref<2x2xi32, #tpu.memory_space<smem>>) -> (i32, i32, i32) {
    %c0_i32 = arith.constant 0 : i32
    %c0_i32_0 = arith.constant 0 : i32
    %c0_i32_1 = arith.constant 0 : i32
    return %arg0, %c0_i32, %c0_i32_0 : i32, i32, i32
  }
  func.func @transform_2(%arg0: i32, %arg1: memref<2x2xi32, #tpu.memory_space<smem>>) -> (i32, i32, i32) {
    %c0_i32 = arith.constant 0 : i32
    %c0_i32_0 = arith.constant 0 : i32
    %c0_i32_1 = arith.constant 0 : i32
    return %arg0, %c0_i32, %c0_i32_0 : i32, i32, i32
  }
  func.func @transform_3(%arg0: i32, %arg1: memref<2x2xi32, #tpu.memory_space<smem>>) -> (i32, i32, i32) {
    %c0_i32 = arith.constant 0 : i32
    %c0_i32_0 = arith.constant 0 : i32
    %c0_i32_1 = arith.constant 0 : i32
    return %arg0, %c0_i32, %c0_i32_0 : i32, i32, i32
  }
  func.func @transform_4(%arg0: i32, %arg1: memref<2x2xi32, #tpu.memory_space<smem>>) -> (i32, i32, i32) {
    %c0_i32 = arith.constant 0 : i32
    %c0_i32_0 = arith.constant 0 : i32
    %c0_i32_1 = arith.constant 0 : i32
    return %arg0, %c0_i32, %c0_i32_0 : i32, i32, i32
  }
  func.func @transform_5(%arg0: i32, %arg1: memref<2x2xi32, #tpu.memory_space<smem>>) -> (i32, i32, i32) {
    %c0_i32 = arith.constant 0 : i32
    %c0_i32_0 = arith.constant 0 : i32
    %c0_i32_1 = arith.constant 0 : i32
    return %arg0, %c0_i32, %c0_i32_0 : i32, i32, i32
  }
  func.func @transform_6(%arg0: i32, %arg1: memref<2x2xi32, #tpu.memory_space<smem>>) -> (i32, i32, i32) {
    %c0_i32 = arith.constant 0 : i32
    %c0_i32_0 = arith.constant 0 : i32
    %c0_i32_1 = arith.constant 0 : i32
    return %arg0, %c0_i32, %c0_i32_0 : i32, i32, i32
  }
  func.func @transform_7(%arg0: i32, %arg1: memref<2x2xi32, #tpu.memory_space<smem>>) -> (i32, i32, i32) {
    %c0_i32 = arith.constant 0 : i32
    %c0_i32_0 = arith.constant 0 : i32
    %c0_i32_1 = arith.constant 0 : i32
    return %arg0, %c0_i32, %c0_i32_0 : i32, i32, i32
  }
}

</mosaic_0001>

<bundles_post_ra>
// kernel: tpu_custom_call.1
= control target key start
LH: loop header
LB: loop body
LE: loop exit
PB: predicated region body
PF: predicated region fallthrough
CT: control target
= control target key end

     0   :  { %s1191_s0 = inlined_call_operand.vmem [shape: s32[2,2], index: 0, kind: input, shape index: {}]   ;;  %s1192_s1 = inlined_call_operand.vmem [shape: f32[2,8,32], index: 1, kind: input, shape index: {}]   ;;  %s1193_s2 = inlined_call_operand.vmem [shape: f32[2,8,16], index: 2, kind: input, shape index: {}]   ;;  %s1194_s3 = inlined_call_operand.vmem [shape: f32[2,8,4], index: 3, kind: input, shape index: {}]   ;;  %s1195_s4 = inlined_call_operand.vmem [shape: f32[2,8,4], index: 4, kind: input, shape index: {}]   ;;  %s1196_s5 = inlined_call_operand.hbm [shape: f32[2,8,32], index: 5, kind: output, shape index: {0}]   ;;  %s1197_s6 = inlined_call_operand.hbm [shape: f32[2,8,16], index: 6, kind: output, shape index: {1}]   ;;  %s1198_s7 = inlined_call_operand.hbm [shape: s32[2,1,8], index: 7, kind: output, shape index: {2}]   ;;  %s1199_s8 = inlined_call_operand.vmem [shape: f32[2,16,4], index: 8, kind: output, shape index: {3}]  }
   0x1   :  { %1203 = sst [smem:[#allocation12_spill]] %s1192_s1  ;;  %s14_s29 = sshll.u32 %s1191_s0, 4  ;;  %s15_s29 = int_to_ptr.vmem [resolvable:$true] %s14_s29 }
   0x2   :  { %s769_s30 = scalar_lea.vmem %s15_s29, 32  ;;  %p774_p1 = scmp.lt.s32.totalorder %s15_s29, %s15_s29 }
   0x3   :  { %p770_p0 = scmp.ne.s32.totalorder %s15_s29, %s769_s30  ;;  %p775_p2 = scmp.lt.s32.totalorder %s769_s30, %s769_s30 }
   0x5   :  { %p776_p3 = por %p775_p2, %p774_p1 }
   0x7   :  { %p777_p4 = pnand %p776_p3, %p770_p0 }
   0x9   :  { %780 = shalt.err (!%p777_p4)  }
   0xa   :  { %s907_s9 = smov [#allocation3]  }
   0xb   :  { %17 = dma.vmem_to_smem %s15_s29, 32, %s907_s9, [#allocation2] }
   0xc   :  { %881 = dma.done.wait [#allocation2], 32 }
   0xd   :  { %882 = vsyncadd [#allocation2], 4294967264 }
   0xe   :  { %19 = sfence }
   0xf   :  { %20 = vsyncpa [#allocation5], 0 }
  0x10   :  { %22 = vsyncpa [#allocation5 + $0x1], 0 }
  0x11   :  { %23 = vsyncpa [#allocation7], 0 }
  0x12   :  { %25 = vsyncpa [#allocation7 + $0x1], 0  ;;  %s961_s10 = smov 0   ;;  %s963_s0 = smov 0  }
  0x13   :  { %s965_s11 = smov 0   ;;  %s967_s12 = smov 0  }
  0x14 LB: > { %s982_s13 = sadd.s32 4294967295, %s905_s12   ;;  %s1200_s14 = sadd.s32 4294967294, %s905_s12   ;;  %s905_s12 = sphi %s967_s12, %s1213_s12   ;;  %s901_s11 = sphi %s965_s11, %s1212_s11   ;;  %s897_s0 = sphi %s963_s0, %s1211_s0   ;;  %s893_s10 = sphi %s961_s10, %s1210_s10  }
  0x15   : > { %s986_s15 = sadd.s32 1, %s905_s12   ;;  %s142_s16 = sadd.s32 1, %s901_s11 }
  0x16   : > { %s139_s17 = ssub.s32 %s905_s12, %s986_s15  ;;  %p152_p5 = scmp.ne.s32.totalorder %s901_s11, %s897_s0 }
  0x17   : > { %p140_p6 = scmp.eq.s32.totalorder %s139_s17, 0  ;;  %p153_p7 = scmp.eq.s32.totalorder %s982_s13, 1 }
  0x18   : > { %p158_p8 = scmp.ne.s32.totalorder %s897_s0, %s893_s10  ;;  %p159_p9 = scmp.eq.s32.totalorder %s1200_s14, 1 }
  0x19   : > { %s999_s18 = scalar_select %p140_p6, %s901_s11, %s142_s16  }
  0x1a   : > { %p1001_p10 = por %p153_p7, %p152_p5  ;;  %p1005_p11 = por %p159_p9, %p158_p8 }
  0x1b   : > { %p689_p12 = scmp.ge.s32.totalorder %s905_s12, 1  ;;  %p283_p13 = scmp.lt.s32.totalorder %s905_s12, 3 }
  0x1d   : > { %p284_p0 = pnand %p689_p12, %p283_p13 }
  0x1e   : > { %p340_p1 = scmp.lt.s32.totalorder (!%p284_p0), %s982_s13, 1  ;;  %v379_v0 = vlaneseq (!%p284_p0)  ;;  %vm377_vm1 = vcmask (!%p284_p0), 130048   ;;  %s908_s29 = smov (!%p284_p0), 126   ;;  %vm427_vm4 = vcmask (!%p284_p0), 15360   ;;  %vm449_vm5 = vcmask (!%p284_p0), 31744  }
  0x1f   : > { %287 = sbr.rel (%p284_p0) target bundleno = 501 (0x1f5), region = 36  ;;  %s1201_s17 = smov (!%p284_p0), 2   ;;  %vm368_vm7 = vcmask (!%p284_p0), 261120  }
  0x20   : > { %v1016_v1 = vand.u32 (!%p284_p0), 127, %v379_v0  ;;  %s1042_s23 = sshll.u32 (!%p284_p0), %s982_s13, 7  ;;  %s1206_s1 = sld [smem:[#allocation12_spill]] (!%p284_p0) }
  0x21   : > { %s412_s24 = sadd.s32 (!%p284_p0), 1, %s1042_s23  ;;  %s910_s14 = smov (!%p284_p0), [#allocation6]  }
  0x22   : > { %vm381_vm0 = vcmp.eq.s32.totalorder (!%p284_p0), %v1016_v1, 15  ;;  %s413_s26 = sld [smem:[#allocation3 + %s412_s24]] (!%p284_p0)  ;;  %v442_v16 = vand.u32 (!%p284_p0), 1, %v1016_v1  ;;  %s1082_s24 = scalar_lea.hbm (!%p284_p0), %s1197_s6, %s1042_s23 }
  0x24   : > { %vm443_vm3 = vcmp.eq.s32.totalorder (!%p284_p0), %v442_v16, 0 }
  0x26   : > { %s1013_s21 = scalar_select %p340_p1, %s982_s13, 1 }
  0x28   : > { %s1019_s22 = sshll.u32 %s1013_s21, 3 }
  0x29   : > { %s347_s25 = scalar_lea.vmem %s1193_s2, %s1019_s22  ;;  %s351_s28 = scalar_lea.vmem %s1194_s3, %s1019_s22 }
  0x2a   : > { %v370_v2 = vld [vmem:[%s347_s25] sm:$0xff]  ;;  %s355_s16 = scalar_lea.vmem %s1195_s4, %s1019_s22  ;;  %s410_s25 = sld [smem:[#allocation3 + %s1042_s23]] }
  0x2b   : > { %v382_v3 = vsel %vm381_vm0, -inf, %v370_v2  ;;  %v415_v4 = vld [vmem:[%s351_s28] sm:$0xff]  ;;  %s414_s28 = scvt.s32.f32 %s413_s26  ;;  %v699_v26 = vmul.f32 -1.442695, %v370_v2 }
  0x2c   : > { %v383_v5 = vsel %vm377_vm1, %v382_v3, -inf  ;;  %v416_v6 = vmul.f32 0.5, %v415_v4  ;;  %v1035_v7 = vld [vmem:[%s355_s16] sm:$0xff] }
  0x2d   : > { %384 = vmax.xlane.f32.xlu0 %v383_v5  ;;  %v430_v8 = vmul.f32 0.5, %v1035_v7  ;;  %v444_v18 = vstv %s414_s28  ;;  %761 = vpow2.f32 %v699_v26  ;;  %s457_s28 = sand.u32 1, %s982_s13  }
  0x2e   : > { %418 = vrot.lane.b32.xlu1 %v416_v6, %s908_s29 }
  0x30   : > { %s411_s27 = scvt.s32.f32 %s410_s25  ;;  %s1084_s25 = scalar_lea.sflag [#allocation7], %s457_s28 }
  0x32   : > { %432 = vrot.lane.b32.xlu1 %v430_v8, %s908_s29  ;;  %v445_v19 = vstv %s411_s27  ;;  %s708_s29 = sshll.u32 %s1013_s21, 4  ;;  %s343_s21 = scalar_lea.vmem %s1206_s1, %s1019_s22 }
  0x33   : > { %v1050_v21 = vsel %vm443_vm3, %v444_v18, %v445_v19  ;;  %s1055_s16 = scalar_lea.vmem %s1199_s8, %s708_s29  ;;  %v361_v25 = vld [vmem:[%s343_s21] sm:$0xff]  ;;  %s1069_s22 = sand.u32 1, %s897_s0  }
  0x34   : > { %v698_v27 = vmul.f32 -1.442695, %v361_v25  ;;  %s1202_s26 = sshll.u32 %s1069_s22, 3 }
  0x35   : > { %s326_s27 = scalar_lea.vmem [#allocation6], %s1202_s26 }
  0x36   : > { %763 = vpow2.f32 %v698_v27  ;;  %s493_s29 = sshll.u32 %s326_s27, 4  ;;  %s494_s29 = int_to_ptr.vmem [resolvable:$true] %s493_s29 }
  0x37   : > { %v762_v31 = vpop.eup %761  ;;  %s781_s21 = scalar_lea.vmem %s494_s29, 128 }
  0x38   : > { %v374_v34 = vadd.f32 1.0, %v762_v31  ;;  %p782_p2 = scmp.ne.s32.totalorder %s494_s29, %s781_s21 }
  0x3a   : > { %765 = vrcp.f32 %v374_v34  ;;  %p783_p3 = pnand %p782_p2, %p1001_p10 }
  0x3c   : > { %p784_p4 = pneg %p783_p3 }
  0x40   : > { %v764_v33 = vpop.eup %763 }
  0x41   : > { %v365_v35 = vadd.f32 1.0, %v764_v33 }
  0x43   : > { %767 = vrcp.f32 %v365_v35 }
  0x44   : > { %v766_v36 = vpop.eup %765 }
  0x45   : > { %378 = vst.msk [vmem:[%s326_s27] sm:$0xff] %vm377_vm1, %v766_v36 }
  0x4d   : > { %v768_v37 = vpop.eup %767 }
  0xa0   : > { %v419_v9 = vpop.permute.xlu1 %418 }
  0xa1   : > { %v422_v10 = vadd.f32 %v419_v9, %v415_v4  ;;  %v421_v20 = vsub.f32 %v415_v4, %v419_v9 }
  0xa3   : > { %424 = vrot.lane.b32.xlu1 %v422_v10, %s1201_s17  ;;  %s785_s17 = sshll.u32 %s910_s14, 4  ;;  %s786_s17 = int_to_ptr.vmem [resolvable:$false] %s785_s17 }
  0xa4   : > { %v1047_v17 = vpop.permute.xlu1 %432  ;;  %s787_s26 = scalar_lea.vmem %s786_s17, 256  ;;  %p788_p5 = scmp.lt.s32.totalorder %s494_s29, %s786_s17 }
  0xa5   : > { %v436_v38 = vadd.f32 %v1047_v17, %v1035_v7  ;;  %p789_p6 = scmp.lt.s32.totalorder %s787_s26, %s781_s21 }
  0xa7   : > { %p790_p7 = por %p789_p6, %p788_p5 }
  0xa9   : > { %p791_p8 = pnand %p790_p7, %p784_p4 }
  0xba   : > { %v385_v11 = vpop.xlane.xlu0 %384 }
  0xbb   : > { %vm386_vm2 = vcmp.eq.f32.partialorder %v382_v3, %v385_v11 }
  0xbc   : > { %v387_v12 = vsel %vm386_vm2, %v1016_v1, 16 }
  0xbd   : > { %v388_v13 = vsel %vm377_vm1, %v387_v12, 2147483647 }
  0xbe   : > { %v390_v14 = vshra.s32 %v388_v13, 16  ;;  %v389_v28 = vand.u32 65535, %v388_v13 }
  0xc0   : > { %v392_v15 = vcvt.s32.f32 %v390_v14  ;;  %v391_v30 = vcvt.s32.f32 %v389_v28 }
  0xc2   : > { %393 = vmin.xlane.f32.xlu0 %v392_v15 }
 0x115   : > { %v425_v22 = vpop.permute.xlu1 %424 }
 0x116   : > { %v428_v23 = vsel %vm427_vm4, %v421_v20, %v425_v22 }
 0x117   : > { %v447_v24 = vmul.f32 %v1050_v21, %v428_v23 }
 0x119   : > { %450 = vst.msk [vmem:[%s1055_s16] sm:$0xff] %vm449_vm5, %v447_v24 }
 0x14f   : > { %v1065_v29 = vpop.xlane.xlu0 %393 }
 0x150   : > { %vm395_vm6 = vcmp.eq.f32.partialorder %v392_v15, %v1065_v29 }
 0x151   : > { %v396_v32 = vsel %vm395_vm6, %v391_v30, inf }
 0x152   : > { %397 = vmin.xlane.f32.xlu0 %v396_v32 }
 0x153   : > { %794 = shalt.err (!%p791_p8)
}
 0x154   : > { %s795_s27 = scalar_lea.hbm %s1082_s24, 128  ;;  %s799_s14 = scalar_lea.hbm %s1197_s6, 256 }
 0x155   : > { %p796_p9 = scmp.ne.s32.totalorder %s1082_s24, %s795_s27  ;;  %p800_p0 = scmp.lt.u32.totalorder %s1082_s24, %s1197_s6 }
 0x156   : > { %p801_p1 = scmp.lt.u32.totalorder %s799_s14, %s795_s27  ;;  %p803_p3 = scmp.lt.u32.totalorder %s795_s27, %s1082_s24 }
 0x157   : > { %p797_p12 = pnand %p796_p9, %p1001_p10 }
 0x158   : > { %p802_p2 = por %p801_p1, %p800_p0 }
 0x159   : > { %p798_p13 = pneg %p797_p12 }
 0x15a   : > { %p804_p4 = por %p803_p3, %p802_p2 }
 0x15c   : > { %p805_p5 = pnand %p804_p4, %p798_p13 }
 0x15e   : > { %808 = shalt.err (!%p805_p5)
}
 0x15f   : > { %710 = dma.vmem_to_hbm [thread:$0]  (%p1001_p10), %s494_s29, 128, %s1082_s24, %s1084_s25  }
 0x160   : > { %s1207_s26 = sshll.u32 %s1069_s22, 3  ;;  %s1208_s28 = smov 2  }
 0x161   : > { %s319_s21 = scalar_lea.vmem [#allocation4], %s1207_s26  ;;  %s1112_s14 = scalar_lea.hbm %s1196_s5, %s1042_s23 }
 0x162   : > { %369 = vst.msk [vmem:[%s319_s21] sm:$0xff] %vm368_vm7, %v768_v37  ;;  %s480_s9 = sshll.u32 %s319_s21, 4  ;;  %s453_s17 = scalar_lea.sflag [#allocation5], %s1069_s22  ;;  %s481_s9 = int_to_ptr.vmem [resolvable:$true] %s480_s9 }
 0x163   : > { %s809_s1 = scalar_lea.vmem %s481_s9, 128  ;;  %s911_s29 = smov [#allocation4]  }
 0x164   : > { %p810_p6 = scmp.ne.s32.totalorder %s481_s9, %s809_s1  ;;  %s813_s24 = sshll.u32 %s911_s29, 4  ;;  %s814_s24 = int_to_ptr.vmem [resolvable:$false] %s813_s24 }
 0x165   : > { %s815_s26 = scalar_lea.vmem %s814_s24, 256  ;;  %p816_p9 = scmp.lt.s32.totalorder %s481_s9, %s814_s24 }
 0x166   : > { %p811_p7 = pnand %p810_p6, %p1001_p10  ;;  %p817_p12 = scmp.lt.s32.totalorder %s815_s26, %s809_s1 }
 0x168   : > { %438 = vrot.lane.b32.xlu0 %v436_v38, %s1208_s28  ;;  %p812_p8 = pneg %p811_p7  ;;  %p818_p13 = por %p817_p12, %p816_p9 }
 0x16a   : > { %p819_p0 = pnand %p818_p13, %p812_p8 }
 0x16c   : > { %822 = shalt.err (!%p819_p0)
}
 0x16d   : > { %s823_s23 = scalar_lea.hbm %s1112_s14, 128  ;;  %s827_s30 = scalar_lea.hbm %s1196_s5, 256 }
 0x16e   : > { %p824_p1 = scmp.ne.s32.totalorder %s1112_s14, %s823_s23  ;;  %p828_p4 = scmp.lt.u32.totalorder %s1112_s14, %s1196_s5 }
 0x16f   : > { %p829_p5 = scmp.lt.u32.totalorder %s827_s30, %s823_s23  ;;  %p831_p7 = scmp.lt.u32.totalorder %s823_s23, %s1112_s14 }
 0x170   : > { %p825_p2 = pnand %p824_p1, %p1001_p10 }
 0x171   : > { %p830_p6 = por %p829_p5, %p828_p4 }
 0x172   : > { %p826_p3 = pneg %p825_p2 }
 0x173   : > { %p832_p8 = por %p831_p7, %p830_p6 }
 0x175   : > { %p833_p9 = pnand %p832_p8, %p826_p3 }
 0x177   : > { %836 = shalt.err (!%p833_p9)
}
 0x178   : > { %709 = dma.vmem_to_hbm [thread:$0]  (%p1001_p10), %s481_s9, 128, %s1112_s14, %s453_s17   ;;  %v400_v39 = vcvt.f32.s32 %v1065_v29  ;;  %v404_v40 = vshrl.u32 %v379_v0, 7  ;;  %v435_v45 = vsub.f32 %v1035_v7, %v1047_v17  ;;  %vm407_vm8 = vcmask 57344  }
 0x179   : > { %s705_s1 = sshll.u32 %s982_s13, 4  ;;  %s332_s24 = scalar_lea.vmem [#allocation8], %s1069_s22 }
 0x17a   : > { %v401_v42 = vshll.u32 %v400_v39, 16  ;;  %v405_v43 = vsub.s32 %v1016_v1, %v404_v40  ;;  %s506_s26 = sshll.u32 %s332_s24, 4  ;;  %s1143_s17 = scalar_lea.hbm %s1198_s7, %s705_s1  ;;  %s1145_s26 = int_to_ptr.vmem [resolvable:$true] %s506_s26 }
 0x17b   : > { %s837_s13 = scalar_lea.vmem %s1145_s26, 16  ;;  %s912_s22 = smov [#allocation8]  }
 0x17c   : > { %p838_p12 = scmp.ne.s32.totalorder %s1145_s26, %s837_s13  ;;  %s841_s23 = sshll.u32 %s912_s22, 4  ;;  %s842_s23 = int_to_ptr.vmem [resolvable:$false] %s841_s23 }
 0x17d   : > { %s843_s21 = scalar_lea.vmem %s842_s23, 32  ;;  %p844_p1 = scmp.lt.s32.totalorder %s1145_s26, %s842_s23 }
 0x17e   : > { %p839_p13 = pnand %p838_p12, %p1001_p10  ;;  %p845_p2 = scmp.lt.s32.totalorder %s843_s21, %s837_s13 }
 0x180   : > { %p840_p0 = pneg %p839_p13  ;;  %p846_p3 = por %p845_p2, %p844_p1 }
 0x182   : > { %p847_p4 = pnand %p846_p3, %p840_p0 }
 0x1df   : > { %v398_v41 = vpop.xlane.xlu0 %397 }
 0x1e0   : > { %v399_v44 = vcvt.f32.s32 %v398_v41 }
 0x1e2   : > { %v402_v46 = vadd.s32 %v401_v42, %v399_v44 }
 0x1e3   : > { %v439_v47 = vpop.permute.xlu0 %438 }
 0x1e4   : > { %v406_v48 = vrot.slane %v402_v46, %v405_v43  ;;  %v441_v49 = vsel %vm427_vm4, %v435_v45, %v439_v47 }
 0x1e5   : > { %v448_v50 = vmul.f32 %v1050_v21, %v441_v49 }
 0x1e6   : > { %408 = vst.msk [vmem:[%s332_s24] sm:$0x1] %vm407_vm8, %v406_v48 }
 0x1e7   : > { %451 = vst.msk [vmem:[%s1055_s16 + $0x8] sm:$0xff] %vm449_vm5, %v448_v50 }
 0x1e8   : > { %850 = shalt.err (!%p847_p4)
}
 0x1e9   : > { %s851_s16 = scalar_lea.hbm %s1143_s17, 16  ;;  %s855_s27 = scalar_lea.hbm %s1198_s7, 32 }
 0x1ea   : > { %p852_p5 = scmp.ne.s32.totalorder %s1143_s17, %s851_s16  ;;  %p856_p8 = scmp.lt.u32.totalorder %s1143_s17, %s1198_s7 }
 0x1eb   : > { %p857_p9 = scmp.lt.u32.totalorder %s855_s27, %s851_s16  ;;  %p859_p13 = scmp.lt.u32.totalorder %s851_s16, %s1143_s17 }
 0x1ec   : > { %p853_p6 = pnand %p852_p5, %p1001_p10 }
 0x1ed   : > { %p858_p12 = por %p857_p9, %p856_p8 }
 0x1ee   : > { %p854_p7 = pneg %p853_p6 }
 0x1ef   : > { %p860_p0 = por %p859_p13, %p858_p12 }
 0x1f1   : > { %p861_p1 = pnand %p860_p0, %p854_p7 }
 0x1f3   : > { %864 = shalt.err (!%p861_p1)
}
 0x1f4   : > { %711 = dma.vmem_to_hbm [thread:$0]  (%p1001_p10), %s1145_s26, 16, %s1143_s17, %s1084_s25  }
 0x1f5 PF: > { %p725_p2 = scmp.ge.s32.totalorder %s905_s12, 2  ;;  %s521_s24 = sand.u32 1, %s893_s10  }
 0x1f6   : > { %s522_s14 = scalar_lea.sflag [#allocation5], %s521_s24 }
 0x1f7   : > { %p716_p3 = pnand %p725_p2, %p1005_p11 }
 0x1f9   : > { %884 = dma.done.wait (!%p716_p3), %s522_s14, 128  }
 0x1fa   : > { %886 = vsyncadd (!%p716_p3), %s522_s14, 4294967168  ;;  %s1209_s9 = sadd.s32 4294967294, %s905_s12  }
 0x1fb   : > { %s530_s13 = sand.u32 1, %s1209_s9  }
 0x1fc   : > { %s531_s22 = scalar_lea.sflag [#allocation7], %s530_s13 }
 0x1fd   : > { %888 = dma.done.wait (!%p716_p3), %s531_s22, 144  }
 0x1fe   : > { %890 = vsyncadd (!%p716_p3), %s531_s22, 4294967152  ;;  %p28_p10 = scmp.ge.s32.totalorder %s986_s15, 4   ;;  %s1210_s10 = smov %s897_s0 }
 0x1ff   : > { %s1211_s0 = smov %s901_s11  ;;  %s1212_s11 = smov %s999_s18 }
 0x200   : > { %s1213_s12 = smov %s986_s15  ;;  %30 = sbr.rel (!%p28_p10) target bundleno = 20 (0x14), region = 124 }
 0x207   :  { %552 = vsyncpa [#allocation5], 1 }
 0x208   :  { %554 = vsyncpa [#allocation5 + $0x1], 1 }
 0x209   :  { %555 = vsyncpa [#allocation7], 1 }
 0x20a   :  { %557 = vsyncpa [#allocation7 + $0x1], 1 }

</bundles_post_ra>
